<compile_context>
chip_gen: v5e
topology: v5e:2x2
jax: 0.10.0
libtpu: 0.0.40
codegen_flags: <defaults>
</compile_context>

<pallas_src>
import jax
import jax.numpy as jnp
from jax.experimental import pallas as pl
from jax.experimental.pallas import tpu as pltpu


def _patchify_kernel(x_ref, s_ref, o_ref):
    """One grid step (b, c):  o[b] += x_strips(b, c) @ S_c.

    x_ref: (Hp, P*W)            all Hp row-strips of channel c of image b
    s_ref: (P*W, Wp*patch_dim)  per-channel scatter matrix S_c
    o_ref: (Hp, Wp*patch_dim)   VMEM-resident output block for image b
    """
    @pl.when(pl.program_id(1) == 0)
    def _():
        o_ref[...] = jnp.zeros_like(o_ref)

    o_ref[...] += jnp.dot(
        x_ref[...], s_ref[...], preferred_element_type=jnp.float32
    ).astype(o_ref.dtype)


def _build_channel_scatter_matrices(C, W, P, dtype):
    """S of shape (C, P*W, Wp*patch_dim); S[c, pr*W + w, n] = 1 iff
    n = (w // P) * patch_dim + c*P*P + pr*P + (w % P)."""
    Wp = W // P
    patch_dim = C * P * P
    pr, w = jnp.meshgrid(jnp.arange(P), jnp.arange(W), indexing="ij")   # (P, W)
    base = ((w // P) * patch_dim + pr * P + (w % P)).reshape(-1)        # (P*W,)
    dst = base[None, :] + (jnp.arange(C) * P * P)[:, None]              # (C, P*W)
    return jax.nn.one_hot(dst, Wp * patch_dim, dtype=dtype)             # (C, P*W, Wp*patch_dim)


def patchify(x, patch_size):
    B, C, H, W = x.shape
    P = patch_size
    assert H % P == 0 and W % P == 0, "image size must be divisible by patch size"
    Hp, Wp = H // P, W // P
    patch_dim = C * P * P
    num_patches = Hp * Wp
    Kb = P * W                 # matmul K: one channel's P-row strip
    Nb = Wp * patch_dim        # matmul N: one full output patch-row

    x_r = x.reshape(B, C, Hp, Kb)                              # free reshape of NCHW
    S = _build_channel_scatter_matrices(C, W, P, x.dtype)      # 0/1, exact in any float dtype

    out3 = pl.pallas_call(
        _patchify_kernel,
        out_shape=jax.ShapeDtypeStruct((B, Hp, Nb), x.dtype),
        grid=(B, C),
        in_specs=[
            # one (channel, image) slab: (Hp, P*W) strips, visited exactly once
            pl.BlockSpec((None, None, Hp, Kb), lambda b, c: (b, c, 0, 0)),
            # per-channel scatter matrix, reused for all Hp rows of the image
            pl.BlockSpec((None, Kb, Nb), lambda b, c: (c, 0, 0)),
        ],
        # constant block index along the C (reduction) axis -> VMEM-resident accumulator
        out_specs=pl.BlockSpec((None, Hp, Nb), lambda b, c: (b, 0, 0)),
        compiler_params=pltpu.CompilerParams(
            dimension_semantics=("parallel", "arbitrary")
        ),
    )(x_r, S)

    return out3.reshape(B, num_patches, patch_dim)             # free reshape


def patchify_reference(x, P):
    """Pure-JAX reference mirroring the PyTorch unfold/permute/reshape."""
    B, C, H, W = x.shape
    Hp, Wp = H // P, W // P
    x = x.reshape(B, C, Hp, P, Wp, P)
    x = x.transpose(0, 2, 4, 1, 3, 5)        # (B, Hp, Wp, C, P, P)
    return x.reshape(B, Hp * Wp, C * P * P)


if __name__ == "__main__":
    base_key = jax.random.PRNGKey(0)

    # (B, C, img_size, patch_size) — primary spec-sized config plus one extra
    # config to show there is no dependence on "nice" tile divisors.
    configs = [
        (2, 4, 16, 4),
        (2, 3, 32, 8),
    ]

    for idx, (B, C, img_size, patch_size) in enumerate(configs):
        key = jax.random.fold_in(base_key, idx)
        x = jax.random.normal(key, (B, C, img_size, img_size), dtype=jnp.float32)

        out = jax.block_until_ready(patchify(x, patch_size))
        ref = patchify_reference(x, patch_size)

        expected_shape = (
            B,
            (img_size // patch_size) ** 2,
            C * patch_size * patch_size,
        )
        assert out.shape == expected_shape, (out.shape, expected_shape)
        assert jnp.allclose(out, ref, atol=0, rtol=0), "Pallas patchify mismatch"

    print("KERNEL_OK")
</pallas_src>

<mosaic_0001>
module attributes {stable_mosaic.version = 11 : i64} {
  func.func @_patchify_kernel(%arg0: i32, %arg1: i32, %arg2: memref<1x1x4x64xf32, #tpu.memory_space<vmem>>, %arg3: memref<1x64x256xf32, #tpu.memory_space<vmem>>, %arg4: memref<1x4x256xf32, #tpu.memory_space<vmem>>) attributes {dimension_semantics = [#tpu.dimension_semantics<parallel>, #tpu.dimension_semantics<arbitrary>], iteration_bounds = array<i64: 2, 4>, scalar_prefetch = 0 : i64, scratch_operands = 0 : i64, tpu.core_type = #tpu.core_type<tc>, window_params = [{transform_indices = @transform_0, window_bounds = array<i64: 1, 1, 4, 64>}, {transform_indices = @transform_1, window_bounds = array<i64: 1, 64, 256>}, {transform_indices = @transform_2, window_bounds = array<i64: 1, 4, 256>}]} {
    %c0_i32 = arith.constant 0 : i32
    %0 = arith.cmpi eq, %arg1, %c0_i32 : i32
    %1 = arith.extui %0 : i1 to i32
    %c0_i32_0 = arith.constant 0 : i32
    %2 = arith.cmpi ne, %1, %c0_i32_0 : i32
    scf.if %2 {
      %cst_13 = arith.constant 0.000000e+00 : f32
      %14 = vector.broadcast %cst_13 : f32 to vector<4x256xf32>
      %c0_14 = arith.constant 0 : index
      %c0_15 = arith.constant 0 : index
      %c0_16 = arith.constant 0 : index
      %15 = vector.load %arg4[%c0_14, %c0_15, %c0_16] : memref<1x4x256xf32, #tpu.memory_space<vmem>>, vector<1x4x256xf32>
      %16 = vector.shape_cast %15 : vector<1x4x256xf32> to vector<4x256xf32>
      %17 = vector.shape_cast %14 : vector<4x256xf32> to vector<1x4x256xf32>
      tpu.vector_store %arg4[%c0_14, %c0_15, %c0_16], %17 {strides = array<i32>} : memref<1x4x256xf32, #tpu.memory_space<vmem>>, vector<1x4x256xf32>,
    } else {
    }
    %c0 = arith.constant 0 : index
    %c0_1 = arith.constant 0 : index
    %c0_2 = arith.constant 0 : index
    %3 = vector.load %arg4[%c0, %c0_1, %c0_2] : memref<1x4x256xf32, #tpu.memory_space<vmem>>, vector<1x4x256xf32>
    %4 = vector.shape_cast %3 : vector<1x4x256xf32> to vector<4x256xf32>
    %c0_3 = arith.constant 0 : index
    %c0_4 = arith.constant 0 : index
    %c0_5 = arith.constant 0 : index
    %c0_6 = arith.constant 0 : index
    %5 = vector.load %arg2[%c0_3, %c0_4, %c0_5, %c0_6] : memref<1x1x4x64xf32, #tpu.memory_space<vmem>>, vector<1x1x4x64xf32>
    %6 = vector.shape_cast %5 : vector<1x1x4x64xf32> to vector<4x64xf32>
    %c0_7 = arith.constant 0 : index
    %c0_8 = arith.constant 0 : index
    %c0_9 = arith.constant 0 : index
    %7 = vector.load %arg3[%c0_7, %c0_8, %c0_9] : memref<1x64x256xf32, #tpu.memory_space<vmem>>, vector<1x64x256xf32>
    %8 = vector.shape_cast %7 : vector<1x64x256xf32> to vector<64x256xf32>
    %cst = arith.constant dense<0.000000e+00> : vector<4x256xf32>
    %9 = tpu.matmul %6, %8, %cst {dimension_numbers = #tpu.dot_dimension_numbers<[1], [0], [0], [1], [0, 0, 1, 1], [], []>} : vector<4x64xf32>, vector<64x256xf32>, vector<4x256xf32> -> vector<4x256xf32>
    %10 = arith.addf %4, %9 : vector<4x256xf32>
    %c0_10 = arith.constant 0 : index
    %c0_11 = arith.constant 0 : index
    %c0_12 = arith.constant 0 : index
    %11 = vector.load %arg4[%c0_10, %c0_11, %c0_12] : memref<1x4x256xf32, #tpu.memory_space<vmem>>, vector<1x4x256xf32>
    %12 = vector.shape_cast %11 : vector<1x4x256xf32> to vector<4x256xf32>
    %13 = vector.shape_cast %10 : vector<4x256xf32> to vector<1x4x256xf32>
    tpu.vector_store %arg4[%c0_10, %c0_11, %c0_12], %13 {strides = array<i32>} : memref<1x4x256xf32, #tpu.memory_space<vmem>>, vector<1x4x256xf32>,
    return
  }
  func.func @transform_0(%arg0: i32, %arg1: i32) -> (i32, i32, i32, i32) {
    %c0_i32 = arith.constant 0 : i32
    %c0_i32_0 = arith.constant 0 : i32
    %c0_i32_1 = arith.constant 0 : i32
    return %arg0, %arg1, %c0_i32, %c0_i32_0 : i32, i32, i32, i32
  }
  func.func @transform_1(%arg0: i32, %arg1: i32) -> (i32, i32, i32) {
    %c0_i32 = arith.constant 0 : i32
    %c0_i32_0 = arith.constant 0 : i32
    %c0_i32_1 = arith.constant 0 : i32
    return %arg1, %c0_i32, %c0_i32_0 : i32, i32, i32
  }
  func.func @transform_2(%arg0: i32, %arg1: i32) -> (i32, i32, i32) {
    %c0_i32 = arith.constant 0 : i32
    %c0_i32_0 = arith.constant 0 : i32
    %c0_i32_1 = arith.constant 0 : i32
    return %arg0, %c0_i32, %c0_i32_0 : i32, i32, i32
  }
}

</mosaic_0001>

<bundles_post_ra>
// kernel: tpu_custom_call.1
= control target key start
LH: loop header
LB: loop body
LE: loop exit
PB: predicated region body
PF: predicated region fallthrough
CT: control target
= control target key end

     0   :  { %s1091_s0 = inlined_call_operand.hbm [shape: f32[2,4,4,64], index: 0, kind: input, shape index: {}]   ;;  %s1092_s1 = inlined_call_operand.hbm [shape: f32[4,64,256], index: 1, kind: input, shape index: {}]   ;;  %s1093_s2 = inlined_call_operand.hbm [shape: f32[2,4,256], index: 2, kind: output, shape index: {}]  }
   0x1   :  { %1099 = sst [smem:[#allocation19_spill]] %s1091_s0 }
   0x2   :  { %7 = vsyncpa [#allocation3], 0 }
   0x3   :  { %9 = vsyncpa [#allocation3 + $0x1], 0 }
   0x4   :  { %10 = vsyncpa [#allocation6], 0 }
   0x5   :  { %12 = vsyncpa [#allocation6 + $0x1], 0 }
   0x6   :  { %13 = vsyncpa [#allocation4], 0 }
   0x7   :  { %15 = vsyncpa [#allocation4 + $0x1], 0  ;;  %s805_s9 = smov 0   ;;  %s807_s10 = smov 0  }
   0x8   :  { %s809_s11 = smov 0   ;;  %s811_s12 = smov 0  }
   0x9   :  { %s813_s13 = smov 0   ;;  %s815_s14 = smov 0  }
   0xa   :  { %s817_s15 = smov 0   ;;  %s819_s16 = smov 0  }
   0xb   :  { %s821_s17 = smov 0   ;;  %s823_s18 = smov 0  }
   0xc   :  { %s825_s19 = smov 0   ;;  %s827_s20 = smov 0  }
   0xd   :  { %s829_s21 = smov 0   ;;  %s831_s22 = smov 0  }
   0xe LB: > { %1100 = sst [smem:[#allocation11_spill]] %s741_s11  ;;  %s417_s23 = sadd.s32 4294967295, %s785_s22   ;;  %s785_s22 = sphi %s831_s22, %s21_s22   ;;  %s781_s21 = sphi %s829_s21, %s1136_s21   ;;  %s777_s20 = sphi %s827_s20, %s1135_s20   ;;  %s773_s19 = sphi %s825_s19, %s1124_s19   ;;  %s769_s18 = sphi %s823_s18, %s1134_s18   ;;  %s765_s17 = sphi %s821_s17, %s1123_s17   ;;  %s761_s16 = sphi %s819_s16, %s1133_s16   ;;  %s757_s15 = sphi %s817_s15, %s1132_s15   ;;  %s753_s14 = sphi %s815_s14, %s1131_s14   ;;  %s749_s13 = sphi %s813_s13, %s1130_s13   ;;  %s745_s12 = sphi %s811_s12, %s1129_s12   ;;  %s741_s11 = sphi %s809_s11, %s1120_s11   ;;  %s737_s10 = sphi %s807_s10, %s1128_s10   ;;  %s733_s9 = sphi %s805_s9, %s1127_s9  }
   0xf   : > { %1101 = sst [smem:[#allocation12_spill]] %s765_s17  ;;  %s30_s25 = sadd.s32 1, %s777_s20 }
  0x10   : > { %1102 = sst [smem:[#allocation13_spill]] %s781_s21  ;;  %s33_s26 = sadd.s32 1, %s781_s21 }
  0x11   : > { %p31_p0 = scmp.ge.s32.totalorder %s30_s25, 4  ;;  %s42_s27 = sadd.s32 1, %s765_s17 }
  0x12   : > { %p49_p1 = scmp.ne.s32.totalorder %s765_s17, %s761_s16  ;;  %p50_p2 = scmp.eq.s32.totalorder %s785_s22, 0 }
  0x13   : > { %s1138_s25 = smov (%p31_p0, %s30_s25), 0  ;;  %s1140_s26 = smov (!%p31_p0, %s33_s26), %s781_s21 }
  0x14   : > { %1103 = sst [smem:[#allocation14_spill]] %s1138_s25  ;;  %s38_s28 = ssub.s32 %s777_s20, %s1138_s25 }
  0x15   : > { %p888_p3 = por %p50_p2, %p49_p1  ;;  %p35_p4 = scmp.ge.s32.totalorder %s1140_s26, 2 }
  0x16   : > { %p55_p5 = scmp.ne.s32.totalorder %s761_s16, %s757_s15  ;;  %p895_p6 = scmp.eq.s32.totalorder %s417_s23, 0 }
  0x17   : > { %p66_p7 = scmp.eq.s32.totalorder %s38_s28, 0  ;;  %s1142_s26 = smov (%p35_p4, %s1140_s26), 0 }
  0x18   : > { %1106 = sst [smem:[#allocation15_spill]] %s1142_s26  ;;  %p903_p8 = por %p895_p6, %p55_p5 }
  0x19   : > { %s68_s4 = sadd.s32 1, %s753_s14  ;;  %s37_s5 = ssub.s32 %s781_s21, %s1142_s26 }
  0x1a   : > { %p75_p9 = scmp.ne.s32.totalorder %s753_s14, %s749_s13  ;;  %s39_s6 = sor.u32 %s38_s28, %s37_s5 }
  0x1b   : > { %p81_p10 = scmp.ne.s32.totalorder %s749_s13, %s745_s12  ;;  %p40_p11 = scmp.eq.s32.totalorder %s39_s6, 0 }
  0x1c   : > { %p916_p12 = por %p75_p9, %p50_p2  ;;  %p92_p0 = scmp.eq.s32.totalorder %s37_s5, 0 }
  0x1d   : > { %s921_s8 = scalar_select %p66_p7, %s753_s14, %s68_s4  }
  0x1e   : > { %s924_s15 = scalar_select %p40_p11, %s765_s17, %s42_s27  }
  0x1f   : > { %1109 = sst [smem:[#allocation16_spill]] %s921_s8  ;;  %p928_p13 = por %p81_p10, %p895_p6 }
  0x20   : > { %1110 = sst [smem:[#allocation17_spill]] %s924_s15  ;;  %s94_s12 = sadd.s32 1, %s741_s11 }
  0x21   : > { %p104_p1 = scmp.ne.s32.totalorder %s741_s11, %s737_s10  ;;  %p105_p2 = scmp.eq.s32.totalorder %s417_s23, 7 }
  0x22   : > { %s936_s28 = scalar_select %p92_p0, %s741_s11, %s94_s12  }
  0x23   : > { %p110_p4 = scmp.ne.s32.totalorder %s737_s10, %s733_s9  ;;  %s1113_s4 = sadd.s32 4294967294, %s785_s22  }
  0x24   : > { %1112 = sst [smem:[#allocation18_spill]] %s936_s28  ;;  %p111_p5 = scmp.eq.s32.totalorder %s1113_s4, 7 }
  0x25   : > { %p944_p7 = por %p105_p2, %p104_p1  ;;  %p458_p6 = scmp.lt.s32.totalorder %s785_s22, 8 }
  0x26   : > { %p949_p9 = por %p111_p5, %p110_p4  ;;  %s131_s5 = sand.u32 1, %s765_s17  }
  0x27   : > { %s421_s6 = sshll.u32 %s131_s5, 2  ;;  %s422_s23 = sshll.u32 %s781_s21, 2 }
  0x28   : > { %s139_s12 = sadd.s32 %s777_s20, %s422_s23  ;;  %s135_s26 = scalar_lea.vmem [#allocation2], %s421_s6 }
  0x29   : > { %s145_s25 = sshll.u32 %s135_s26, 4  ;;  %s423_s4 = sshll.u32 %s139_s12, 2  ;;  %s146_s25 = int_to_ptr.vmem [resolvable:$true] %s145_s25 }
  0x2a   : > { %s1116_s0 = sld [smem:[#allocation19_spill]]  ;;  %p448_p10 = pnand %p458_p6, %p888_p3 }
  0x2b   : > { %p967_p11 = pnand %p458_p6, %p916_p12  ;;  %s132_s6 = scalar_lea.sflag [#allocation3], %s131_s5 }
  0x2c   : > { %p427_p0 = scmp.ge.s32.totalorder %s785_s22, 1  ;;  %p172_p1 = scmp.lt.s32.totalorder %s785_s22, 9 }
  0x2d   : > { %s152_s26 = sand.u32 1, %s753_s14   ;;  %s439_s8 = sshll.u32 %s777_s20, 7 }
  0x2e   : > { %s424_s23 = sshll.u32 %s152_s26, 7  ;;  %p173_p2 = pnand %p427_p0, %p172_p1 }
  0x2f   : > { %s156_s29 = scalar_lea.vmem [#allocation5], %s424_s23  ;;  %s161_s7 = scalar_lea.hbm %s1092_s1, %s439_s8 }
  0x30   : > { %s141_s28 = scalar_lea.hbm %s1116_s0, %s423_s4  ;;  %s164_s15 = sshll.u32 %s156_s29, 4  ;;  %s165_s15 = int_to_ptr.vmem [resolvable:$true] %s164_s15 }
  0x31   : > { %s143_s11 = sshll.u32 %s141_s28, 4  ;;  %s162_s4 = sshll.u32 %s161_s7, 4  ;;  %s144_s11 = int_to_ptr.hbm [resolvable:$true] %s143_s11  ;;  %s163_s4 = int_to_ptr.hbm [resolvable:$true] %s162_s4 }
  0x32   : > { %450 = dma.hbm_to_vmem [thread:$0]  (!%p448_p10), %s144_s11, 64, %s146_s25, %s132_s6  }
  0x33   : > { %s153_s0 = scalar_lea.sflag [#allocation6], %s152_s26  ;;  %s787_s21 = smov 256  }
  0x34   : > { %s788_s5 = smov 16   ;;  %176 = sbr.rel (%p173_p2) target bundleno = 221 (0xdd), region = 28 }
  0x35   : > { %453 = dma.hbm_to_vmem [thread:$0]  (!%p967_p11), %s163_s4, 2048, %s165_s15, %s153_s0, %s787_s21, %s787_s21, %s788_s5  }
  0x36   : > { %s178_s11 = sand.u32 (!%p173_p2), 1, %s761_s16  }
  0x37   : > { %s981_s25 = sshll.u32 (!%p173_p2), %s178_s11, 2  ;;  %s179_s6 = scalar_lea.sflag (!%p173_p2), [#allocation3], %s178_s11 }
  0x38   : > { %s182_s23 = scalar_lea.vmem (!%p173_p2), [#allocation2], %s981_s25 }
  0x39   : > { %720 = dma.done.wait (%p903_p8), %s179_s6, 64  }
  0x3a   : > { %722 = vsyncadd (%p903_p8), %s179_s6, 4294967232  ;;  %s188_s26 = sand.u32 1, %s749_s13  }
  0x3b   : > { %s429_s8 = sshll.u32 %s188_s26, 7  ;;  %s189_s17 = scalar_lea.sflag [#allocation6], %s188_s26 }
  0x3c   : > { %s989_s0 = scalar_lea.vmem [#allocation5], %s429_s8 }
  0x3d   : > { %724 = dma.done.wait (%p928_p13), %s189_s17, 2048  }
  0x3e   : > { %726 = vsyncadd (%p928_p13), %s189_s17, 4294965248  ;;  %s216_s21 = sand.u32 1, %s737_s10   ;;  %p431_p3 = scmp.ne.s32.totalorder %s769_s18, 0 }
  0x3f   : > { %s430_s29 = sshll.u32 %s216_s21, 3 }
  0x40   : > { %s998_s15 = scalar_lea.vmem [#allocation7], %s430_s29  ;;  %222 = sbr.rel (%p431_p3) target bundleno = 71 (0x47), region = 40 }
  0x45   : > { %v789_v0 = vmov 0.0  }
  0x46   : > { %223 = vst [vmem:[%s998_s15] sm:$0xff] %v789_v0 }
  0x47 PF: > { %v241_v1 = vld [vmem:[%s989_s0 + $0x78] sm:$0xff]  ;;  %v240_v2 = vld [vmem:[%s989_s0 + $0x70] sm:$0xff]  ;;  %v239_v3 = vld [vmem:[%s989_s0 + $0x68] sm:$0xff]  ;;  %vm242_vm0 = vcmask 523264   ;;  %s440_s18 = sshll.u32 %s773_s19, 3  ;;  %vm289_vm1 = vcmask 1043456  }
  0x48   : > { %274 = vmatpush.msra.mxu1 %v241_v1  ;;  %254 = vmatpush.msra.mxu0 %v240_v2  ;;  %v238_v4 = vld [vmem:[%s989_s0 + $0x60] sm:$0xff]  ;;  %v237_v5 = vld [vmem:[%s989_s0 + $0x58] sm:$0xff]  ;;  %v236_v6 = vld [vmem:[%s989_s0 + $0x50] sm:$0xff]  ;;  %s306_s12 = scalar_lea.hbm %s1093_s2, %s440_s18  ;;  %s308_s28 = sshll.u32 %s998_s15, 4  ;;  %s309_s28 = int_to_ptr.vmem [resolvable:$true] %s308_s28 }
  0x49   : > { %v235_v7 = vld [vmem:[%s989_s0 + $0x48] sm:$0xff]  ;;  %v234_v8 = vld [vmem:[%s989_s0 + $0x40] sm:$0xff]  ;;  %v233_v9 = vld [vmem:[%s989_s0 + $0x38] sm:$0xff]  ;;  %s310_s7 = sshll.u32 %s306_s12, 4  ;;  %s295_s4 = scalar_lea.sflag [#allocation4], %s216_s21  ;;  %s311_s7 = int_to_ptr.hbm [resolvable:$true] %s310_s7 }
  0x4a   : > { %275 = vmatpush.msra.mxu1 %v239_v3  ;;  %255 = vmatpush.msra.mxu0 %v238_v4  ;;  %v232_v10 = vld [vmem:[%s989_s0 + $0x30] sm:$0xff]  ;;  %v231_v11 = vld [vmem:[%s989_s0 + $0x28] sm:$0xff]  ;;  %v230_v12 = vld [vmem:[%s989_s0 + $0x20] sm:$0xff]  ;;  %s649_s19 = sshra.s32 %s311_s7, 4  ;;  %s655_s6 = scalar_lea.hbm %s1093_s2, 16  ;;  %s650_s19 = int_to_ptr.hbm [resolvable:$true] %s649_s19 }
  0x4b   : > { %v229_v13 = vld [vmem:[%s989_s0 + $0x18] sm:$0xff]  ;;  %v228_v14 = vld [vmem:[%s989_s0 + $0x10] sm:$0xff]  ;;  %v227_v15 = vld [vmem:[%s989_s0 + $0x8] sm:$0xff]  ;;  %s651_s5 = scalar_lea.hbm %s650_s19, 8  ;;  %p656_p4 = scmp.lt.s32.totalorder %s650_s19, %s1093_s2 }
  0x4c   : > { %276 = vmatpush.msra.mxu1 %v237_v5  ;;  %256 = vmatpush.msra.mxu0 %v236_v6  ;;  %v226_v16 = vld [vmem:[%s989_s0] sm:$0xff]  ;;  %v225_v17 = vld [vmem:[%s182_s23] sm:$0xf]  ;;  %p652_p8 = scmp.ne.s32.totalorder %s650_s19, %s651_s5  ;;  %p657_p5 = scmp.lt.s32.totalorder %s655_s6, %s651_s5 }
  0x4d   : > { %v224_v21 = vld [vmem:[%s998_s15] sm:$0xff] }
  0x4e   : > { %277 = vmatpush.msra.mxu1 %v235_v7  ;;  %257 = vmatpush.msra.mxu0 %v234_v8  ;;  %p653_p12 = pnand %p652_p8, %p944_p7  ;;  %p658_p6 = por %p657_p5, %p656_p4 }
  0x50   : > { %278 = vmatpush.msra.mxu1 %v233_v9  ;;  %258 = vmatpush.msra.mxu0 %v232_v10  ;;  %p654_p13 = pneg %p653_p12 }
  0x52   : > { %279 = vmatpush.msra.mxu1 %v231_v11  ;;  %259 = vmatpush.msra.mxu0 %v230_v12  ;;  %p659_p10 = pnand %p658_p6, %p654_p13 }
  0x54   : > { %280 = vmatpush.msra.mxu1 %v229_v13  ;;  %260 = vmatpush.msra.mxu0 %v228_v14 }
  0x56   : > { %281 = vmatpush.msra.mxu1 %v227_v15  ;;  %261 = vmatpush.msra.mxu0 %v226_v16 }
  0x57   : > { %433 = vmatmul.msk.f32.vlgmr.msra.gmra.mxu1 %vm242_vm0, %v225_v17  ;;  %432 = vmatmul.msk.f32.vlgmr.msra.gmra.mxu0 %vm242_vm0, %v225_v17 }
  0xd4   : > { %v283_v18 = vpop.f32.mrf.mxu1  ;;  %v263_v19 = vpop.f32.mrf.mxu0 }
  0xd5   : > { %v288_v20 = vrot.slane %v283_v18, 4 }
  0xd7   : > { %v290_v22 = vsel %vm289_vm1, %v263_v19, %v288_v20 }
  0xd8   : > { %v292_v23 = vadd.f32 %v290_v22, %v224_v21 }
  0xda   : > { %293 = vst [vmem:[%s998_s15] sm:$0xff] %v292_v23 }
  0xdb   : > { %662 = shalt.err (!%p659_p10)
}
  0xdc   : > { %445 = dma.vmem_to_hbm [thread:$0]  (%p944_p7), %s309_s28, 128, %s311_s7, %s295_s4  }
  0xdd PF: > { %p459_p11 = scmp.ge.s32.totalorder %s785_s22, 2  ;;  %s322_s8 = sand.u32 1, %s733_s9  }
  0xde   : > { %s323_s17 = scalar_lea.sflag [#allocation4], %s322_s8 }
  0xdf   : > { %p455_p0 = pnand %p459_p11, %p949_p9 }
  0xe1   : > { %p456_p1 = pneg %p455_p0 }
  0xe3   : > { %728 = dma.done.wait (%p456_p1), %s323_s17, 128  }
  0xe4   : > { %730 = vsyncadd (%p456_p1), %s323_s17, 4294967168  ;;  %s21_s22 = sadd.s32 1, %s785_s22   ;;  %s1119_s27 = sld [smem:[#allocation11_spill]] }
  0xe5   : > { %p1044_p2 = scmp.ge.s32.totalorder %s21_s22, 10   ;;  %s1120_s11 = sld [smem:[#allocation18_spill]] }
  0xe6   : > { %s1121_s21 = sld [smem:[#allocation16_spill]]  ;;  %s1127_s9 = smov %s737_s10 }
  0xe7   : > { %s1122_s29 = sld [smem:[#allocation12_spill]]  ;;  %s1129_s12 = smov %s749_s13 }
  0xe8   : > { %s1123_s17 = sld [smem:[#allocation17_spill]]  ;;  %s1130_s13 = smov %s753_s14 }
  0xe9   : > { %s1124_s19 = sld [smem:[#allocation13_spill]]  ;;  %s1132_s15 = smov %s761_s16 }
  0xea   : > { %s1125_s30 = sld [smem:[#allocation14_spill]]  ;;  %s1128_s10 = smov %s1119_s27 }
  0xeb   : > { %s1126_s24 = sld [smem:[#allocation15_spill]]  ;;  %s1134_s18 = smov %s777_s20 }
  0xec   : > { %s1131_s14 = smov %s1121_s21 }
  0xed   : > { %s1133_s16 = smov %s1122_s29  ;;  %20 = sbr.rel (!%p1044_p2) target bundleno = 14 (0xe), region = 90 }
  0xf0   : > { %s1135_s20 = smov %s1125_s30 }
  0xf1   : > { %s1136_s21 = smov %s1126_s24 }
  0xf2   :  { %329 = vsyncpa [#allocation3], 1 }
  0xf3   :  { %331 = vsyncpa [#allocation3 + $0x1], 1 }
  0xf4   :  { %332 = vsyncpa [#allocation6], 1 }
  0xf5   :  { %334 = vsyncpa [#allocation6 + $0x1], 1 }
  0xf6   :  { %335 = vsyncpa [#allocation4], 1 }
  0xf7   :  { %337 = vsyncpa [#allocation4 + $0x1], 1 }

</bundles_post_ra>
